<compile_context>
chip_gen: v6e
topology: v6e:2x2x1
jax: 0.10.0
libtpu: 0.0.40
codegen_flags: <defaults>
</compile_context>

<pallas_src>
import functools

import jax
import jax.numpy as jnp
from jax.experimental import pallas as pl
from jax.experimental.pallas import tpu as pltpu

_LANES = 128
_SUBLANES = 8
_CHUNK_ROWS = 64  # rows per in-kernel chunk; multiple of 8/16/32 (f32/bf16/i8 tiles)


def _round_up(x, m):
    return -(-x // m) * m


def _quantile_loss_kernel(
    p_ref, t_ref, out_ref, *, sum_q, n_q, rows_valid, tb, ch, need_mask
):
    n_chunks = tb // ch
    block_row0 = pl.program_id(0) * tb
    # Hoisted out of the chunk loop (JAX does not CSE broadcast_in_dim).
    row_iota = jax.lax.broadcasted_iota(jnp.int32, (ch, _LANES), 0)

    def chunk_body(c, acc):
        start = pl.multiple_of(c * ch, ch)
        p = p_ref[pl.ds(start, ch), :].astype(jnp.float32)
        t = t_ref[pl.ds(start, ch), :].astype(jnp.float32)
        e = t - p
        # sum_q max((q-1)*e, q*e) == (sum_q q)*e + Q*max(-e, 0)  (exact identity)
        contrib = jnp.float32(sum_q) * e + jnp.float32(n_q) * jnp.maximum(
            -e, jnp.float32(0.0)
        )
        if need_mask:
            # Mask garbage rows of the boundary block (rows >= rows_valid).
            limit = rows_valid - block_row0 - start  # scalar (int32)
            contrib = jnp.where(row_iota < limit, contrib, jnp.float32(0.0))
        # Vreg-shaped partial: (ch,128) -> (ch//8, 8, 128) -> sum leading axis.
        # Pure VPU adds across vregs; no cross-lane/XLU reduce in the kernel.
        return acc + contrib.reshape(ch // _SUBLANES, _SUBLANES, _LANES).sum(axis=0)

    acc = jax.lax.fori_loop(
        0, n_chunks, chunk_body, jnp.zeros((_SUBLANES, _LANES), jnp.float32)
    )
    out_ref[...] = acc[None]


def quantile_loss(preds, targets, quantiles, *, tile_rows=4096):
    """Pallas implementation of QuantileLoss.forward.

    preds, targets: arrays of identical (arbitrary) shape.
    Returns a scalar float32 matching the PyTorch module.
    """
    assert preds.shape == targets.shape, (
        "Predictions and targets must have the same shape."
    )
    n_elements = int(preds.size)
    if n_elements == 0:
        # torch.mean of an empty tensor is NaN.
        return jnp.float32(jnp.nan)

    rows = -(-n_elements // _LANES)  # ceil(n / 128)
    pad_elems = rows * _LANES - n_elements

    def _prep(x):
        flat = x.reshape(-1)  # free (bitcast) for contiguous inputs
        if pad_elems:
            # TODO(synk): lane-ragged inputs (n % 128 != 0) still pay one full
            # HBM copy here; a zero-copy path would need 1-D blocks + in-kernel
            # masking of the final partial row.
            flat = jnp.pad(flat, (0, pad_elems))
        return flat.reshape(rows, _LANES)

    p2 = _prep(preds)
    t2 = _prep(targets)

    # Tile size: a multiple of the in-kernel chunk; aim for >= 2 blocks when
    # there is enough work so the "parallel" grid axis can split across v7x's
    # two TensorCores, while keeping blocks as large as possible.
    tile_rows = max(_CHUNK_ROWS, (int(tile_rows) // _CHUNK_ROWS) * _CHUNK_ROWS)
    half_rows = _round_up(max(-(-rows // 2), 1), _CHUNK_ROWS)
    tb = max(_CHUNK_ROWS, min(tile_rows, half_rows))
    num_blocks = -(-rows // tb)
    need_mask = (rows % tb) != 0  # boundary block with garbage rows exists

    kernel = functools.partial(
        _quantile_loss_kernel,
        sum_q=float(sum(float(q) for q in quantiles)),
        n_q=float(len(quantiles)),
        rows_valid=rows,
        tb=tb,
        ch=_CHUNK_ROWS,
        need_mask=need_mask,
    )

    # Raise scoped-VMEM so bigger tiles are never throttled on v5e's 16 MiB
    # default (2 inputs x 2 pipeline buffers x per-block bytes + slack).
    in_block_bytes = tb * _LANES * (p2.dtype.itemsize + t2.dtype.itemsize)
    vmem_limit = int(min(96 << 20, max(32 << 20, 2 * in_block_bytes + (4 << 20))))

    cost = pl.CostEstimate(
        flops=6 * n_elements,
        transcendentals=0,
        bytes_accessed=n_elements
        * (preds.dtype.itemsize + targets.dtype.itemsize)
        + num_blocks * _SUBLANES * _LANES * 4,
    )

    partials = pl.pallas_call(
        kernel,
        out_shape=jax.ShapeDtypeStruct((num_blocks, _SUBLANES, _LANES), jnp.float32),
        grid_spec=pltpu.PrefetchScalarGridSpec(
            num_scalar_prefetch=0,
            grid=(num_blocks,),
            in_specs=[
                pl.BlockSpec((tb, _LANES), lambda i: (i, 0)),
                pl.BlockSpec((tb, _LANES), lambda i: (i, 0)),
            ],
            out_specs=pl.BlockSpec((1, _SUBLANES, _LANES), lambda i: (i, 0, 0)),
        ),
        compiler_params=pltpu.CompilerParams(
            dimension_semantics=("parallel",),
            vmem_limit_bytes=vmem_limit,
        ),
        cost_estimate=cost,
    )(p2, t2)

    # Tiny final reduce + mean in the wrapper (also finishes per-core partials).
    return jnp.sum(partials) / jnp.float32(n_elements)


def quantile_loss_ref(preds, targets, quantiles):
    """Pure-JAX reference reproducing the PyTorch semantics."""
    losses = []
    for q in quantiles:
        errors = targets - preds
        losses.append(jnp.maximum((q - 1.0) * errors, q * errors))
    stacked = jnp.stack(losses, axis=1)  # stack dim=1, sum dim=1 == sum over q
    return jnp.mean(jnp.sum(stacked, axis=1))


if __name__ == "__main__":
    quantiles = (0.1, 0.5, 0.9)
    key = jax.random.PRNGKey(0)
    kp, kt, kp2, kt2, kp3, kt3 = jax.random.split(key, 6)

    # Lane-aligned small shape (exercises the masked boundary-block path:
    # rows=16 < tile, no wrapper-side pad/copy).
    preds = jax.random.normal(kp, (16, 128), dtype=jnp.float32)
    targets = jax.random.normal(kt, (16, 128), dtype=jnp.float32)
    out = jax.block_until_ready(quantile_loss(preds, targets, quantiles))
    ref = quantile_loss_ref(preds, targets, quantiles)
    assert jnp.allclose(out, ref, rtol=1e-5, atol=1e-5), (out, ref)

    # Small lane-ragged shape (exercises the zero-pad fallback path).
    preds2 = jax.random.normal(kp2, (7, 33), dtype=jnp.float32)
    targets2 = jax.random.normal(kt2, (7, 33), dtype=jnp.float32)
    out2 = jax.block_until_ready(quantile_loss(preds2, targets2, quantiles))
    ref2 = quantile_loss_ref(preds2, targets2, quantiles)
    assert jnp.allclose(out2, ref2, rtol=1e-5, atol=1e-5), (out2, ref2)

    # Lane-aligned, exactly tile-divisible shape (no mask, 2 parallel blocks).
    preds3 = jax.random.normal(kp3, (128, 128), dtype=jnp.float32)
    targets3 = jax.random.normal(kt3, (128, 128), dtype=jnp.float32)
    out3 = jax.block_until_ready(quantile_loss(preds3, targets3, quantiles))
    ref3 = quantile_loss_ref(preds3, targets3, quantiles)
    assert jnp.allclose(out3, ref3, rtol=1e-5, atol=1e-5), (out3, ref3)

    print("KERNEL_OK")
</pallas_src>

<mosaic_0001>
module attributes {stable_mosaic.version = 11 : i64} {
  func.func @_quantile_loss_kernel(%arg0: i32, %arg1: memref<64x128xf32, #tpu.memory_space<vmem>>, %arg2: memref<64x128xf32, #tpu.memory_space<vmem>>, %arg3: memref<1x8x128xf32, #tpu.memory_space<vmem>>) attributes {dimension_semantics = [#tpu.dimension_semantics<parallel>], iteration_bounds = array<i64: 1>, scalar_prefetch = 0 : i64, scratch_operands = 0 : i64, tpu.core_type = #tpu.core_type<tc>, window_params = [{transform_indices = @transform_0, window_bounds = array<i64: 64, 128>}, {transform_indices = @transform_1, window_bounds = array<i64: 64, 128>}, {transform_indices = @transform_2, window_bounds = array<i64: 1, 8, 128>}]} {
    %c64_i32 = arith.constant 64 : i32
    %0 = arith.muli %arg0, %c64_i32 : i32
    %1 = tpu.iota {dimensions = array<i32: 0>} : vector<64x128xi32>
    %cst = arith.constant 0.000000e+00 : f32
    %2 = vector.broadcast %cst : f32 to vector<8x128xf32>
    %c0_i32 = arith.constant 0 : i32
    %c64_i32_0 = arith.constant 64 : i32
    %3 = arith.muli %c0_i32, %c64_i32_0 : i32
    %4 = tpu.assume_multiple %3, 64 : i32
    %5 = arith.index_cast %4 : i32 to index
    %c0 = arith.constant 0 : index
    %6 = vector.load %arg1[%5, %c0] : memref<64x128xf32, #tpu.memory_space<vmem>>, vector<64x128xf32>
    %7 = arith.index_cast %4 : i32 to index
    %c0_1 = arith.constant 0 : index
    %8 = vector.load %arg2[%7, %c0_1] : memref<64x128xf32, #tpu.memory_space<vmem>>, vector<64x128xf32>
    %9 = arith.subf %8, %6 : vector<64x128xf32>
    %cst_2 = arith.constant 1.500000e+00 : f32
    %10 = vector.broadcast %cst_2 : f32 to vector<64x128xf32>
    %11 = arith.mulf %10, %9 : vector<64x128xf32>
    %cst_3 = arith.constant 0.000000e+00 : f32
    %12 = vector.broadcast %cst_3 : f32 to vector<64x128xf32>
    %13 = arith.subf %12, %9 : vector<64x128xf32>
    %cst_4 = arith.constant 0.000000e+00 : f32
    %14 = vector.broadcast %cst_4 : f32 to vector<64x128xf32>
    %15 = arith.maximumf %13, %14 : vector<64x128xf32>
    %cst_5 = arith.constant 3.000000e+00 : f32
    %16 = vector.broadcast %cst_5 : f32 to vector<64x128xf32>
    %17 = arith.mulf %16, %15 : vector<64x128xf32>
    %18 = arith.addf %11, %17 : vector<64x128xf32>
    %c16_i32 = arith.constant 16 : i32
    %19 = arith.subi %c16_i32, %0 : i32
    %20 = arith.subi %19, %4 : i32
    %21 = vector.broadcast %20 : i32 to vector<64x128xi32>
    %22 = arith.cmpi slt, %1, %21 : vector<64x128xi32>
    %cst_6 = arith.constant 0.000000e+00 : f32
    %23 = vector.broadcast %cst_6 : f32 to vector<64x128xf32>
    %24 = arith.select %22, %18, %23 : vector<64x128xi1>, vector<64x128xf32>
    %25 = vector.shape_cast %24 : vector<64x128xf32> to vector<8x8x128xf32>
    %cst_7 = arith.constant dense<0.000000e+00> : vector<8x128xf32>
    %26 = vector.multi_reduction <add>, %25, %cst_7 [0] : vector<8x8x128xf32> to vector<8x128xf32>
    %27 = arith.addf %2, %26 : vector<8x128xf32>
    %c1_i32 = arith.constant 1 : i32
    %28 = vector.shape_cast %27 : vector<8x128xf32> to vector<1x8x128xf32>
    %c0_8 = arith.constant 0 : index
    %c0_9 = arith.constant 0 : index
    %c0_10 = arith.constant 0 : index
    %29 = vector.load %arg3[%c0_8, %c0_9, %c0_10] : memref<1x8x128xf32, #tpu.memory_space<vmem>>, vector<1x8x128xf32>
    tpu.vector_store %arg3[%c0_8, %c0_9, %c0_10], %28 {strides = array<i32>} : memref<1x8x128xf32, #tpu.memory_space<vmem>>, vector<1x8x128xf32>,
    return
  }
  func.func @transform_0(%arg0: i32) -> (i32, i32) {
    %c0_i32 = arith.constant 0 : i32
    %c0_i32_0 = arith.constant 0 : i32
    return %arg0, %c0_i32 : i32, i32
  }
  func.func @transform_1(%arg0: i32) -> (i32, i32) {
    %c0_i32 = arith.constant 0 : i32
    %c0_i32_0 = arith.constant 0 : i32
    return %arg0, %c0_i32 : i32, i32
  }
  func.func @transform_2(%arg0: i32) -> (i32, i32, i32) {
    %c0_i32 = arith.constant 0 : i32
    %c0_i32_0 = arith.constant 0 : i32
    %c0_i32_1 = arith.constant 0 : i32
    return %arg0, %c0_i32, %c0_i32_0 : i32, i32, i32
  }
}

</mosaic_0001>

<bundles_post_ra>
// kernel: tpu_custom_call.1
= control target key start
LH: loop header
LB: loop body
LE: loop exit
PB: predicated region body
PF: predicated region fallthrough
CT: control target
= control target key end

     0   :  { %7 = vsyncpa [#allocation3], 0  ;;  %s258_s0 = inlined_call_operand.hbm [shape: f32[16,128], index: 0, kind: input, shape index: {}]   ;;  %s259_s1 = inlined_call_operand.hbm [shape: f32[16,128], index: 1, kind: input, shape index: {}]   ;;  %s260_s2 = inlined_call_operand.hbm [shape: f32[1,8,128], index: 2, kind: output, shape index: {}]  }
   0x1   :  { %8 = vsyncpa [#allocation6], 0 }
   0x2   :  { %9 = vsyncpa [#allocation4], 0 }
   0x3   :  { %14 = vsyncadd [#allocation3], 768  ;;  %s229_s9 = smov [#allocation2]  }
   0x4   :  { %s15_s10 = sshll.u32 %s229_s9, 4  ;;  %s16_s10 = int_to_ptr.vmem [resolvable:$true] %s15_s10 }
   0x5   :  { %s171_s11 = scalar_lea.vmem %s16_s10, 256  ;;  %s175_s12 = scalar_lea.vmem %s16_s10, 1024 }
   0x6   :  { %p172_p0 = scmp.ne.s32.totalorder %s16_s10, %s171_s11  ;;  %p176_p1 = scmp.lt.s32.totalorder %s16_s10, %s16_s10 }
   0x7   :  { %p177_p2 = scmp.lt.s32.totalorder %s175_s12, %s171_s11 }
   0x9   :  { %p178_p3 = por %p177_p2, %p176_p1 }
   0xb   :  { %p179_p4 = pnand %p178_p3, %p172_p0 }
   0xd   :  { %182 = shalt.err (!%p179_p4)
}
   0xe   :  { %s230_s13 = smov 128   ;;  %s231_s14 = smov 8  }
   0xf   :  { %21 = dma.hbm_to_vmem [thread:$0]  %s258_s0, 256, %s16_s10, [#allocation3], %s230_s13, %s230_s13, %s231_s14  }
  0x10   :  { %26 = vsyncadd [#allocation6], 768  ;;  %s232_s17 = smov [#allocation5]  }
  0x11   :  { %s27_s18 = sshll.u32 %s232_s17, 4  ;;  %s28_s18 = int_to_ptr.vmem [resolvable:$true] %s27_s18 }
  0x12   :  { %s191_s19 = scalar_lea.vmem %s28_s18, 256  ;;  %s195_s20 = scalar_lea.vmem %s28_s18, 1024 }
  0x13   :  { %p192_p5 = scmp.ne.s32.totalorder %s28_s18, %s191_s19  ;;  %p196_p6 = scmp.lt.s32.totalorder %s28_s18, %s28_s18 }
  0x14   :  { %p197_p7 = scmp.lt.s32.totalorder %s195_s20, %s191_s19 }
  0x16   :  { %p198_p8 = por %p197_p7, %p196_p6 }
  0x18   :  { %p199_p9 = pnand %p198_p8, %p192_p5 }
  0x1a   :  { %202 = shalt.err (!%p199_p9)
}
  0x1b   :  { %33 = dma.hbm_to_vmem [thread:$0]  %s259_s1, 256, %s28_s18, [#allocation6], %s230_s13, %s230_s13, %s231_s14  }
  0x1c   :  { %223 = dma.done.wait [#allocation3], 1024  }
  0x1d   :  { %224 = vsyncadd [#allocation3], 4294966272 }
  0x1e   :  { %225 = dma.done.wait [#allocation6], 1024  }
  0x1f   :  { %226 = vsyncadd [#allocation6], 4294966272  ;;  %v50_v0 = vld [vmem:[#allocation2] sm:$0xff]  ;;  %v51_v1 = vld [vmem:[#allocation2 + $0x8] sm:$0xff]  ;;  %s233_s0 = smov [#allocation7]  }
  0x20   :  { %v58_v2 = vld [vmem:[#allocation5] sm:$0xff]  ;;  %v59_v3 = vld [vmem:[#allocation5 + $0x8] sm:$0xff]  ;;  %s148_s1 = sshll.u32 %s233_s0, 4  ;;  %s149_s1 = int_to_ptr.vmem [resolvable:$true] %s148_s1 }
  0x21   :  { %v66_v4 = vsub.f32 %v58_v2, %v50_v0  ;;  %v67_v5 = vsub.f32 %v59_v3, %v51_v1  ;;  %s203_s23 = scalar_lea.vmem %s149_s1, 128  ;;  %p208_p11 = scmp.lt.s32.totalorder %s149_s1, %s149_s1 }
  0x22   :  { %p204_p10 = scmp.ne.s32.totalorder %s149_s1, %s203_s23  ;;  %p209_p12 = scmp.lt.s32.totalorder %s203_s23, %s203_s23 }
  0x23   :  { %v82_v6 = vsub.f32 0.0, %v66_v4  ;;  %v83_v7 = vsub.f32 0.0, %v67_v5  ;;  %v74_v8 = vmul.f32 1.5, %v66_v4  ;;  %v75_v10 = vmul.f32 1.5, %v67_v5 }
  0x24   :  { %p210_p13 = por %p209_p12, %p208_p11 }
  0x25   :  { %v90_v9 = vmax.f32 %v82_v6, 0.0  ;;  %v91_v11 = vmax.f32 %v83_v7, 0.0 }
  0x26   :  { %p211_p0 = pnand %p210_p13, %p204_p10 }
  0x27   :  { %v98_v12 = vmul.f32 3.0, %v90_v9  ;;  %v99_v13 = vmul.f32 3.0, %v91_v11 }
  0x29   :  { %v106_v14 = vadd.f32 %v98_v12, %v74_v8  ;;  %v107_v15 = vadd.f32 %v99_v13, %v75_v10 }
  0x2b   :  { %v133_v16 = vadd.f32 %v107_v15, %v106_v14 }
  0x2d   :  { %141 = vst [vmem:[#allocation7] sm:$0xff] %v133_v16 }
  0x2e   :  { %214 = shalt.err (!%p211_p0)
}
  0x2f   :  { %151 = dma.vmem_to_hbm [thread:$0]  %s149_s1, 128, %s260_s2, [#allocation4]  }
  0x30   :  { %227 = dma.done.wait [#allocation4], 128  }
  0x31   :  { %228 = vsyncadd [#allocation4], 4294967168 }
  0x32   :  { %155 = vsyncpa [#allocation3], 1 }
  0x33   :  { %156 = vsyncpa [#allocation6], 1 }
  0x34   :  { %157 = vsyncpa [#allocation4], 1 }

</bundles_post_ra>
